<compile_context>
chip_gen: v7x
topology: tpu7x:2x2x1
jax: 0.10.0
libtpu: 0.0.40
codegen_flags: <defaults>
</compile_context>

<pallas_src>
import functools

import jax
import jax.numpy as jnp
from jax.experimental import pallas as pl
from jax.experimental.pallas import tpu as pltpu

D_MODEL = 32
D_FF = 64
EPS = 1e-6
LANES = 128


def _round_up(x, m):
    return ((x + m - 1) // m) * m


def _ffn_kernel(x_ref, w1_ref, b1_ref, w2_ref, b2_ref, gamma_ref, beta_ref,
                grp_ref, o_ref, *, d_model):
    # x_ref: (TM, 128) -- PACK = 128 // d_model tokens packed per lane-dense row.
    x_f32 = x_ref[...].astype(jnp.float32)
    mm_dtype = w1_ref.dtype                       # bf16 by default (f32 optional)

    # layer1: per-token x @ W1 + b1 (block-diagonal packed), ReLU  -> (TM, PACK*F)
    # MXU operands in mm_dtype, accumulation in f32.
    h = jnp.dot(x_f32.astype(mm_dtype), w1_ref[...],
                preferred_element_type=jnp.float32)
    h = jnp.maximum(h + b1_ref[...], 0.0)

    # layer2: h @ W2 + b2 (block-diagonal packed)                  -> (TM, 128)
    y = jnp.dot(h.astype(mm_dtype), w2_ref[...],
                preferred_element_type=jnp.float32)
    y = y + b2_ref[...]

    # residual (f32)
    z = y + x_f32

    # Per-token LayerNorm over each d_model-lane group.  Group mean / variance
    # are computed as f32 matmuls with a block-diagonal averaging matrix (MXU,
    # lane dense, no cross-lane XLU reductions).  Matches the PyTorch
    # reference: unbiased std (ddof=1) and eps added to std.
    mean = jnp.dot(z, grp_ref[...], preferred_element_type=jnp.float32)
    centered = z - mean
    var_b = jnp.dot(centered * centered, grp_ref[...],
                    preferred_element_type=jnp.float32)          # biased variance
    var_u = var_b * (d_model / (d_model - 1.0))                  # unbiased (torch .std())
    std = jnp.sqrt(var_u)
    inv = pl.reciprocal(std + EPS, approx=False)                 # EUP slot
    out = gamma_ref[...] * (centered * inv) + beta_ref[...]

    o_ref[...] = out.astype(o_ref.dtype)


def positionwise_feed_forward(x, w1, b1, w2, b2, gamma, beta, *,
                              tile_rows=2048, matmul_dtype=jnp.bfloat16):
    """x: (B, S, d_model).  w1: (d_model, d_ff), w2: (d_ff, d_model).

    Activation I/O runs at x.dtype (no extra astype pass: to use bf16 I/O, the
    upstream op should emit bf16).  The two weight matmuls use `matmul_dtype`
    operands with f32 accumulation; residual + LayerNorm math stays f32.
    """
    B, S, D = x.shape
    F = w1.shape[1]
    assert LANES % D == 0, "d_model must divide 128 for the lane packing"
    pack = LANES // D
    n_tok = B * S
    act_dtype = x.dtype

    f32 = jnp.float32
    eye = jnp.eye(pack, dtype=f32)
    w1_bd = jnp.kron(eye, w1.astype(f32)).astype(matmul_dtype)   # (128, pack*F)
    w2_bd = jnp.kron(eye, w2.astype(f32)).astype(matmul_dtype)   # (pack*F, 128)
    b1_p = jnp.tile(b1.astype(f32), pack).reshape(1, pack * F)
    b2_p = jnp.tile(b2.astype(f32), pack).reshape(1, LANES)
    gamma_p = jnp.tile(gamma.astype(f32), pack).reshape(1, LANES)
    beta_p = jnp.tile(beta.astype(f32), pack).reshape(1, LANES)
    grp = jnp.kron(eye, jnp.full((D, D), 1.0 / D, dtype=f32))    # (128, 128), f32

    # Pack tokens: pad only to a multiple of `pack` (at most pack-1 tokens; a
    # no-op when B*S is already divisible, the common case).  The reshape to
    # (rows, 128) is then a free row-major relabel -- no extra HBM pass.
    rows = pl.cdiv(n_tok, pack)
    n_tok_p = rows * pack
    x2d = x.reshape(n_tok, D)
    if n_tok_p != n_tok:
        x2d = jnp.pad(x2d, ((0, n_tok_p - n_tok), (0, 0)))
    x_packed = x2d.reshape(rows, LANES)

    # Row tiling: the last block may be ragged; Pallas masks the partial
    # read/write at the block boundary (padded rows never reach HBM).
    tile_rows = _round_up(max(int(tile_rows), 8), 8)
    tile_rows_eff = min(tile_rows, rows)      # either mult-of-8 or full extent
    grid = (pl.cdiv(rows, tile_rows_eff),)

    bytes_act = jnp.dtype(act_dtype).itemsize
    weight_bytes = int(
        w1_bd.size * w1_bd.dtype.itemsize + w2_bd.size * w2_bd.dtype.itemsize
        + (b1_p.size + b2_p.size + gamma_p.size + beta_p.size + grp.size) * 4)
    cost = pl.CostEstimate(
        flops=int(rows) * (2 * LANES * (pack * F) * 2 + 2 * LANES * LANES * 2),
        transcendentals=int(rows) * LANES * 2,
        bytes_accessed=int(2 * rows * LANES * bytes_act + weight_bytes),
    )

    kernel = functools.partial(_ffn_kernel, d_model=D)

    out_packed = pl.pallas_call(
        kernel,
        out_shape=jax.ShapeDtypeStruct((rows, LANES), act_dtype),
        grid_spec=pltpu.PrefetchScalarGridSpec(
            num_scalar_prefetch=0,
            grid=grid,
            in_specs=[
                pl.BlockSpec((tile_rows_eff, LANES), lambda i: (i, 0)),  # packed tokens
                pl.BlockSpec((LANES, pack * F), lambda i: (0, 0)),       # W1 (block-diag)
                pl.BlockSpec((1, pack * F), lambda i: (0, 0)),           # b1
                pl.BlockSpec((pack * F, LANES), lambda i: (0, 0)),       # W2 (block-diag)
                pl.BlockSpec((1, LANES), lambda i: (0, 0)),              # b2
                pl.BlockSpec((1, LANES), lambda i: (0, 0)),              # gamma
                pl.BlockSpec((1, LANES), lambda i: (0, 0)),              # beta
                pl.BlockSpec((LANES, LANES), lambda i: (0, 0)),          # group-mean matrix
            ],
            out_specs=pl.BlockSpec((tile_rows_eff, LANES), lambda i: (i, 0)),
        ),
        compiler_params=pltpu.CompilerParams(
            dimension_semantics=("parallel",),
            vmem_limit_bytes=48 * 1024 * 1024,   # explicit budget; fits v7x 64 MiB
        ),
        cost_estimate=cost,
    )(x_packed, w1_bd, b1_p, w2_bd, b2_p, gamma_p, beta_p, grp)

    out2d = out_packed.reshape(n_tok_p, D)[:n_tok]
    return out2d.reshape(B, S, D)


def _reference(x, w1, b1, w2, b2, gamma, beta):
    # plain-JAX reference mirroring the PyTorch forward exactly (f32)
    h = jnp.maximum(jnp.einsum("bsd,df->bsf", x, w1) + b1, 0.0)
    y = jnp.einsum("bsf,fd->bsd", h, w2) + b2
    z = y + x
    mean = jnp.mean(z, axis=-1, keepdims=True)
    std = jnp.sqrt(jnp.sum((z - mean) ** 2, axis=-1, keepdims=True) / (z.shape[-1] - 1))
    return gamma * ((z - mean) / (std + EPS)) + beta


if __name__ == "__main__":
    key = jax.random.PRNGKey(0)
    k_x, k_w1, k_b1, k_w2, k_b2 = jax.random.split(key, 5)

    B, S = 2, 8
    x = jax.random.normal(k_x, (B, S, D_MODEL), dtype=jnp.float32)

    # Conv1d weights (out, in, 1) stored transposed as matmul weights:
    # w1 = W_conv1[:, :, 0].T, w2 = W_conv2[:, :, 0].T
    w1 = jax.random.normal(k_w1, (D_MODEL, D_FF), dtype=jnp.float32) * 0.05
    b1 = jax.random.normal(k_b1, (D_FF,), dtype=jnp.float32) * 0.05
    w2 = jax.random.normal(k_w2, (D_FF, D_MODEL), dtype=jnp.float32) * 0.05
    b2 = jax.random.normal(k_b2, (D_MODEL,), dtype=jnp.float32) * 0.05
    gamma = jnp.ones((D_MODEL,), dtype=jnp.float32)
    beta = jnp.zeros((D_MODEL,), dtype=jnp.float32)

    ref = _reference(x, w1, b1, w2, b2, gamma, beta)

    # Default path: bf16 MXU operands, f32 accumulate, f32 residual/LayerNorm.
    out = positionwise_feed_forward(x, w1, b1, w2, b2, gamma, beta)
    out = jax.block_until_ready(out)
    assert out.shape == (B, S, D_MODEL)
    assert out.dtype == x.dtype
    assert jnp.allclose(out, ref, atol=3e-2, rtol=3e-2), "bf16-MXU path mismatch"

    # f32-MXU path (tight correctness check against the reference).
    out_f32 = positionwise_feed_forward(
        x, w1, b1, w2, b2, gamma, beta, matmul_dtype=jnp.float32)
    out_f32 = jax.block_until_ready(out_f32)
    assert jnp.allclose(out_f32, ref, atol=1e-4, rtol=1e-4), "f32-MXU path mismatch"

    # bf16 activation I/O path (upstream emits bf16; halves HBM traffic for
    # this memory-bound op on v6e/v7x).  Math inside the kernel stays f32.
    x_bf16 = x.astype(jnp.bfloat16)
    out_bf16 = positionwise_feed_forward(x_bf16, w1, b1, w2, b2, gamma, beta)
    out_bf16 = jax.block_until_ready(out_bf16)
    assert out_bf16.shape == (B, S, D_MODEL)
    assert out_bf16.dtype == jnp.bfloat16
    out_bf16_f32 = out_bf16.astype(jnp.float32)
    assert bool(jnp.all(jnp.isfinite(out_bf16_f32)))
    assert float(jnp.max(jnp.abs(out_bf16_f32 - ref))) < 0.25, "bf16 I/O path too far off"

    print("KERNEL_OK")
</pallas_src>

<mosaic_0001>
module attributes {stable_mosaic.version = 11 : i64} {
  func.func @_ffn_kernel(%arg0: i32, %arg1: memref<4x128xf32, #tpu.memory_space<vmem>>, %arg2: memref<128x256xbf16, #tpu.memory_space<vmem>>, %arg3: memref<1x256xf32, #tpu.memory_space<vmem>>, %arg4: memref<256x128xbf16, #tpu.memory_space<vmem>>, %arg5: memref<1x128xf32, #tpu.memory_space<vmem>>, %arg6: memref<1x128xf32, #tpu.memory_space<vmem>>, %arg7: memref<1x128xf32, #tpu.memory_space<vmem>>, %arg8: memref<128x128xf32, #tpu.memory_space<vmem>>, %arg9: memref<4x128xf32, #tpu.memory_space<vmem>>) attributes {dimension_semantics = [#tpu.dimension_semantics<parallel>], iteration_bounds = array<i64: 1>, scalar_prefetch = 0 : i64, scratch_operands = 0 : i64, tpu.core_type = #tpu.core_type<tc>, window_params = [{transform_indices = @transform_0, window_bounds = array<i64: 4, 128>}, {pipeline_mode = #tpu.pipeline_mode<synchronous>, transform_indices = @transform_1, window_bounds = array<i64: 128, 256>}, {pipeline_mode = #tpu.pipeline_mode<synchronous>, transform_indices = @transform_2, window_bounds = array<i64: 1, 256>}, {pipeline_mode = #tpu.pipeline_mode<synchronous>, transform_indices = @transform_3, window_bounds = array<i64: 256, 128>}, {pipeline_mode = #tpu.pipeline_mode<synchronous>, transform_indices = @transform_4, window_bounds = array<i64: 1, 128>}, {pipeline_mode = #tpu.pipeline_mode<synchronous>, transform_indices = @transform_5, window_bounds = array<i64: 1, 128>}, {pipeline_mode = #tpu.pipeline_mode<synchronous>, transform_indices = @transform_6, window_bounds = array<i64: 1, 128>}, {pipeline_mode = #tpu.pipeline_mode<synchronous>, transform_indices = @transform_7, window_bounds = array<i64: 128, 128>}, {transform_indices = @transform_8, window_bounds = array<i64: 4, 128>}]} {
    %c0 = arith.constant 0 : index
    %c0_0 = arith.constant 0 : index
    %0 = vector.load %arg1[%c0, %c0_0] : memref<4x128xf32, #tpu.memory_space<vmem>>, vector<4x128xf32>
    %1 = arith.truncf %0 : vector<4x128xf32> to vector<4x128xbf16>
    %c0_1 = arith.constant 0 : index
    %c0_2 = arith.constant 0 : index
    %2 = vector.load %arg2[%c0_1, %c0_2] : memref<128x256xbf16, #tpu.memory_space<vmem>>, vector<128x256xbf16>
    %cst = arith.constant dense<0.000000e+00> : vector<4x256xf32>
    %3 = tpu.matmul %1, %2, %cst {dimension_numbers = #tpu.dot_dimension_numbers<[1], [0], [0], [1], [0, 0, 1, 1], [], []>} : vector<4x128xbf16>, vector<128x256xbf16>, vector<4x256xf32> -> vector<4x256xf32>
    %c0_3 = arith.constant 0 : index
    %c0_4 = arith.constant 0 : index
    %4 = vector.load %arg3[%c0_3, %c0_4] : memref<1x256xf32, #tpu.memory_space<vmem>>, vector<1x256xf32>
    %5 = vector.broadcast %4 : vector<1x256xf32> to vector<4x256xf32>
    %6 = arith.addf %3, %5 : vector<4x256xf32>
    %cst_5 = arith.constant 0.000000e+00 : f32
    %7 = vector.broadcast %cst_5 : f32 to vector<4x256xf32>
    %8 = arith.maximumf %6, %7 : vector<4x256xf32>
    %9 = arith.truncf %8 : vector<4x256xf32> to vector<4x256xbf16>
    %c0_6 = arith.constant 0 : index
    %c0_7 = arith.constant 0 : index
    %10 = vector.load %arg4[%c0_6, %c0_7] : memref<256x128xbf16, #tpu.memory_space<vmem>>, vector<256x128xbf16>
    %cst_8 = arith.constant dense<0.000000e+00> : vector<4x128xf32>
    %11 = tpu.matmul %9, %10, %cst_8 {dimension_numbers = #tpu.dot_dimension_numbers<[1], [0], [0], [1], [0, 0, 1, 1], [], []>} : vector<4x256xbf16>, vector<256x128xbf16>, vector<4x128xf32> -> vector<4x128xf32>
    %c0_9 = arith.constant 0 : index
    %c0_10 = arith.constant 0 : index
    %12 = vector.load %arg5[%c0_9, %c0_10] : memref<1x128xf32, #tpu.memory_space<vmem>>, vector<1x128xf32>
    %13 = vector.broadcast %12 : vector<1x128xf32> to vector<4x128xf32>
    %14 = arith.addf %11, %13 : vector<4x128xf32>
    %15 = arith.addf %14, %0 : vector<4x128xf32>
    %c0_11 = arith.constant 0 : index
    %c0_12 = arith.constant 0 : index
    %16 = vector.load %arg8[%c0_11, %c0_12] : memref<128x128xf32, #tpu.memory_space<vmem>>, vector<128x128xf32>
    %cst_13 = arith.constant dense<0.000000e+00> : vector<4x128xf32>
    %17 = tpu.matmul %15, %16, %cst_13 {dimension_numbers = #tpu.dot_dimension_numbers<[1], [0], [0], [1], [0, 0, 1, 1], [], []>} : vector<4x128xf32>, vector<128x128xf32>, vector<4x128xf32> -> vector<4x128xf32>
    %18 = arith.subf %15, %17 : vector<4x128xf32>
    %19 = arith.mulf %18, %18 : vector<4x128xf32>
    %c0_14 = arith.constant 0 : index
    %c0_15 = arith.constant 0 : index
    %20 = vector.load %arg8[%c0_14, %c0_15] : memref<128x128xf32, #tpu.memory_space<vmem>>, vector<128x128xf32>
    %cst_16 = arith.constant dense<0.000000e+00> : vector<4x128xf32>
    %21 = tpu.matmul %19, %20, %cst_16 {dimension_numbers = #tpu.dot_dimension_numbers<[1], [0], [0], [1], [0, 0, 1, 1], [], []>} : vector<4x128xf32>, vector<128x128xf32>, vector<4x128xf32> -> vector<4x128xf32>
    %cst_17 = arith.constant 1.03225803 : f32
    %22 = vector.broadcast %cst_17 : f32 to vector<4x128xf32>
    %23 = arith.mulf %21, %22 : vector<4x128xf32>
    %24 = math.sqrt %23 : vector<4x128xf32>
    %cst_18 = arith.constant 9.99999997E-7 : f32
    %25 = vector.broadcast %cst_18 : f32 to vector<4x128xf32>
    %26 = arith.addf %24, %25 : vector<4x128xf32>
    %27 = tpu.reciprocal %26 : vector<4x128xf32> -> vector<4x128xf32>
    %c0_19 = arith.constant 0 : index
    %c0_20 = arith.constant 0 : index
    %28 = vector.load %arg6[%c0_19, %c0_20] : memref<1x128xf32, #tpu.memory_space<vmem>>, vector<1x128xf32>
    %29 = arith.mulf %18, %27 : vector<4x128xf32>
    %30 = vector.broadcast %28 : vector<1x128xf32> to vector<4x128xf32>
    %31 = arith.mulf %30, %29 : vector<4x128xf32>
    %c0_21 = arith.constant 0 : index
    %c0_22 = arith.constant 0 : index
    %32 = vector.load %arg7[%c0_21, %c0_22] : memref<1x128xf32, #tpu.memory_space<vmem>>, vector<1x128xf32>
    %33 = vector.broadcast %32 : vector<1x128xf32> to vector<4x128xf32>
    %34 = arith.addf %31, %33 : vector<4x128xf32>
    %c0_23 = arith.constant 0 : index
    %c0_24 = arith.constant 0 : index
    %35 = vector.load %arg9[%c0_23, %c0_24] : memref<4x128xf32, #tpu.memory_space<vmem>>, vector<4x128xf32>
    tpu.vector_store %arg9[%c0_23, %c0_24], %34 {strides = array<i32>} : memref<4x128xf32, #tpu.memory_space<vmem>>, vector<4x128xf32>,
    return
  }
  func.func @transform_0(%arg0: i32) -> (i32, i32) {
    %c0_i32 = arith.constant 0 : i32
    %c0_i32_0 = arith.constant 0 : i32
    return %arg0, %c0_i32 : i32, i32
  }
  func.func @transform_1(%arg0: i32) -> (i32, i32) {
    %c0_i32 = arith.constant 0 : i32
    %c0_i32_0 = arith.constant 0 : i32
    %c0_i32_1 = arith.constant 0 : i32
    return %c0_i32, %c0_i32_0 : i32, i32
  }
  func.func @transform_2(%arg0: i32) -> (i32, i32) {
    %c0_i32 = arith.constant 0 : i32
    %c0_i32_0 = arith.constant 0 : i32
    %c0_i32_1 = arith.constant 0 : i32
    return %c0_i32, %c0_i32_0 : i32, i32
  }
  func.func @transform_3(%arg0: i32) -> (i32, i32) {
    %c0_i32 = arith.constant 0 : i32
    %c0_i32_0 = arith.constant 0 : i32
    %c0_i32_1 = arith.constant 0 : i32
    return %c0_i32, %c0_i32_0 : i32, i32
  }
  func.func @transform_4(%arg0: i32) -> (i32, i32) {
    %c0_i32 = arith.constant 0 : i32
    %c0_i32_0 = arith.constant 0 : i32
    %c0_i32_1 = arith.constant 0 : i32
    return %c0_i32, %c0_i32_0 : i32, i32
  }
  func.func @transform_5(%arg0: i32) -> (i32, i32) {
    %c0_i32 = arith.constant 0 : i32
    %c0_i32_0 = arith.constant 0 : i32
    %c0_i32_1 = arith.constant 0 : i32
    return %c0_i32, %c0_i32_0 : i32, i32
  }
  func.func @transform_6(%arg0: i32) -> (i32, i32) {
    %c0_i32 = arith.constant 0 : i32
    %c0_i32_0 = arith.constant 0 : i32
    %c0_i32_1 = arith.constant 0 : i32
    return %c0_i32, %c0_i32_0 : i32, i32
  }
  func.func @transform_7(%arg0: i32) -> (i32, i32) {
    %c0_i32 = arith.constant 0 : i32
    %c0_i32_0 = arith.constant 0 : i32
    %c0_i32_1 = arith.constant 0 : i32
    return %c0_i32, %c0_i32_0 : i32, i32
  }
  func.func @transform_8(%arg0: i32) -> (i32, i32) {
    %c0_i32 = arith.constant 0 : i32
    %c0_i32_0 = arith.constant 0 : i32
    return %arg0, %c0_i32 : i32, i32
  }
}

</mosaic_0001>

<bundles_post_ra>
// kernel: tpu_custom_call.1
= control target key start
LH: loop header
LB: loop body
LE: loop exit
PB: predicated region body
PF: predicated region fallthrough
CT: control target
= control target key end

     0   :  { %13 = vsyncpa [#allocation3], 0  ;;  %s1159_s0 = inlined_call_operand.hbm [shape: f32[4,128], index: 0, kind: input, shape index: {}]   ;;  %s1160_s1 = inlined_call_operand.hbm [shape: bf16[128,256], index: 1, kind: input, shape index: {}]   ;;  %s1161_s2 = inlined_call_operand.vmem [shape: f32[1,256], index: 2, kind: input, shape index: {}]   ;;  %s1162_s3 = inlined_call_operand.hbm [shape: bf16[256,128], index: 3, kind: input, shape index: {}]   ;;  %s1163_s4 = inlined_call_operand.vmem [shape: f32[1,128], index: 4, kind: input, shape index: {}]   ;;  %s1164_s5 = inlined_call_operand.vmem [shape: f32[1,128], index: 5, kind: input, shape index: {}]   ;;  %s1165_s6 = inlined_call_operand.vmem [shape: f32[1,128], index: 6, kind: input, shape index: {}]   ;;  %s1166_s7 = inlined_call_operand.hbm [shape: f32[128,128], index: 7, kind: input, shape index: {}]   ;;  %s1167_s8 = inlined_call_operand.hbm [shape: f32[4,128], index: 8, kind: output, shape index: {}]  }
   0x1   :  { %14 = vsyncpa [#allocation6], 0 }
   0x2   :  { %15 = vsyncpa [#allocation9], 0 }
   0x3   :  { %16 = vsyncpa [#allocation4], 0  ;;  %s1002_s27 = smov [#allocation5]   ;;  %s884_s9 = scalar_lea.hbm %s1160_s1, 2048 }
   0x4   :  { %s32_s28 = sshll.u32 %s1002_s27, 4  ;;  %p885_p0 = scmp.ne.s32.totalorder %s1160_s1, %s884_s9  ;;  %s33_s28 = int_to_ptr.vmem [resolvable:$true] %s32_s28 }
   0x5   :  { %p888_p1 = scmp.lt.u32.totalorder %s884_s9, %s1160_s1 }
   0x7   :  { %p890_p2 = pnand %p888_p1, %p885_p0 }
   0x9   :  { %893 = shalt.err (!%p890_p2)
}
   0xa   :  { %s894_s14 = scalar_lea.vmem %s33_s28, 2048  ;;  %p899_p4 = scmp.lt.s32.totalorder %s33_s28, %s33_s28 }
   0xb   :  { %p895_p3 = scmp.ne.s32.totalorder %s33_s28, %s894_s14  ;;  %p900_p5 = scmp.lt.s32.totalorder %s894_s14, %s894_s14 }
   0xd   :  { %p901_p6 = por %p900_p5, %p899_p4 }
   0xf   :  { %p902_p7 = pnand %p901_p6, %p895_p3 }
  0x11   :  { %905 = shalt.err (!%p902_p7)
}
  0x12   :  { %s1003_s15 = smov 128   ;;  %s1004_s16 = smov 8  }
  0x13   :  { %38 = dma.hbm_to_vmem [thread:$0]  %s1160_s1, 2048, %s33_s28, [#allocation6], %s1003_s15, %s1003_s15, %s1004_s16  }
  0x14   :  { %s1005_s19 = smov [#allocation2]   ;;  %s1006_s21 = smov [#allocation7]  }
  0x15   :  { %s23_s20 = sshll.u32 %s1005_s19, 4  ;;  %s46_s22 = sshll.u32 %s1006_s21, 4  ;;  %s24_s20 = int_to_ptr.vmem [resolvable:$true] %s23_s20  ;;  %s47_s22 = int_to_ptr.vmem [resolvable:$true] %s46_s22 }
  0x16   :  { %s906_s25 = scalar_lea.hbm %s1159_s0, 64 }
  0x17   :  { %p907_p8 = scmp.ne.s32.totalorder %s1159_s0, %s906_s25  ;;  %p910_p9 = scmp.lt.u32.totalorder %s906_s25, %s1159_s0 }
  0x19   :  { %p912_p10 = pnand %p910_p9, %p907_p8 }
  0x1b   :  { %915 = shalt.err (!%p912_p10)
}
  0x1c   :  { %s916_s1 = scalar_lea.vmem %s24_s20, 64  ;;  %p921_p12 = scmp.lt.s32.totalorder %s24_s20, %s24_s20 }
  0x1d   :  { %p917_p11 = scmp.ne.s32.totalorder %s24_s20, %s916_s1  ;;  %p922_p13 = scmp.lt.s32.totalorder %s916_s1, %s916_s1 }
  0x1f   :  { %p923_p0 = por %p922_p13, %p921_p12 }
  0x21   :  { %p924_p1 = pnand %p923_p0, %p917_p11 }
  0x23   :  { %927 = shalt.err (!%p924_p1)
}
  0x24   :  { %26 = dma.hbm_to_vmem [thread:$0]  %s1159_s0, 64, %s24_s20, [#allocation3]  }
  0x25   :  { %s928_s12 = scalar_lea.hbm %s1162_s3, 2048 }
  0x26   :  { %p929_p2 = scmp.ne.s32.totalorder %s1162_s3, %s928_s12  ;;  %p932_p3 = scmp.lt.u32.totalorder %s928_s12, %s1162_s3 }
  0x28   :  { %p934_p4 = pnand %p932_p3, %p929_p2 }
  0x2a   :  { %937 = shalt.err (!%p934_p4)
}
  0x2b   :  { %s938_s19 = scalar_lea.vmem %s47_s22, 2048  ;;  %p943_p6 = scmp.lt.s32.totalorder %s47_s22, %s47_s22 }
  0x2c   :  { %p939_p5 = scmp.ne.s32.totalorder %s47_s22, %s938_s19  ;;  %p944_p7 = scmp.lt.s32.totalorder %s938_s19, %s938_s19 }
  0x2e   :  { %p945_p8 = por %p944_p7, %p943_p6 }
  0x30   :  { %p946_p9 = pnand %p945_p8, %p939_p5 }
  0x32   :  { %949 = shalt.err (!%p946_p9)
}
  0x33   :  { %s1007_s0 = smov 64   ;;  %s1008_s20 = smov 4  }
  0x34   :  { %52 = dma.hbm_to_vmem [thread:$0]  %s1162_s3, 2048, %s47_s22, [#allocation6], %s1007_s0, %s1007_s0, %s1008_s20  }
  0x35   :  { %s1009_s24 = smov [#allocation8]   ;;  %s950_s29 = scalar_lea.hbm %s1166_s7, 2048 }
  0x36   :  { %s64_s25 = sshll.u32 %s1009_s24, 4  ;;  %p951_p10 = scmp.ne.s32.totalorder %s1166_s7, %s950_s29  ;;  %s65_s25 = int_to_ptr.vmem [resolvable:$true] %s64_s25 }
  0x37   :  { %p954_p11 = scmp.lt.u32.totalorder %s950_s29, %s1166_s7 }
  0x39   :  { %p956_p12 = pnand %p954_p11, %p951_p10 }
  0x3b   :  { %959 = shalt.err (!%p956_p12)
}
  0x3c   :  { %s960_s10 = scalar_lea.vmem %s65_s25, 2048  ;;  %p965_p0 = scmp.lt.s32.totalorder %s65_s25, %s65_s25 }
  0x3d   :  { %p961_p13 = scmp.ne.s32.totalorder %s65_s25, %s960_s10  ;;  %p966_p1 = scmp.lt.s32.totalorder %s960_s10, %s960_s10 }
  0x3f   :  { %p967_p2 = por %p966_p1, %p965_p0 }
  0x41   :  { %p968_p3 = pnand %p967_p2, %p961_p13 }
  0x43   :  { %971 = shalt.err (!%p968_p3)
}
  0x44   :  { %70 = dma.hbm_to_vmem [thread:$0]  %s1166_s7, 2048, %s65_s25, [#allocation9], %s1003_s15, %s1003_s15, %s1004_s16  }
  0x45   :  { %994 = dma.done.wait [#allocation3], 64  }
  0x46   :  { %995 = vsyncadd [#allocation3], 4294967232 }
  0x47   :  { %996 = dma.done.wait [#allocation6], 4096  }
  0x48   :  { %997 = vsyncadd [#allocation6], 4294963200 }
  0x49   :  { %998 = dma.done.wait [#allocation9], 2048  }
  0x4a   :  { %999 = vsyncadd [#allocation9], 4294965248  ;;  %v1010_v0 = vmov 0   ;;  %v840_v1 = vld [vmem:[#allocation5 + $0x4] ss:$8 sps:$4 sm:$0xff]   ;;  %v868_v15 = vld [vmem:[#allocation7 + $0x50] sm:$0xff]   ;;  %v104_v54 = vlaneseq }
  0x4b   :  { %226 = vmatprep.mubr.bf16.mxu0 %v1010_v0  ;;  %v842_v2 = vld [vmem:[#allocation5] ss:$8 sps:$4 sm:$0xff]   ;;  %194 = vmatprep.subr.bf16.mxu0 %v840_v1  ;;  %v843_v3 = vld [vmem:[#allocation5 + $0x14] ss:$8 sps:$4 sm:$0xff]   ;;  %v845_v4 = vld [vmem:[#allocation5 + $0x10] ss:$8 sps:$4 sm:$0xff]  }
  0x4c   :  { %195 = vmatpush1.bf16.msra.mxu0 %v842_v2  ;;  %v846_v5 = vld [vmem:[#allocation5 + $0x24] ss:$8 sps:$4 sm:$0xff]   ;;  %v848_v6 = vld [vmem:[#allocation5 + $0x20] ss:$8 sps:$4 sm:$0xff]   ;;  %v849_v7 = vld [vmem:[#allocation5 + $0x34] ss:$8 sps:$4 sm:$0xff]  }
  0x4d   :  { %196 = vmatprep.subr.bf16.mxu0 %v843_v3  ;;  %v851_v8 = vld [vmem:[#allocation5 + $0x30] ss:$8 sps:$4 sm:$0xff]   ;;  %v852_v9 = vld [vmem:[#allocation5 + $0x44] ss:$8 sps:$4 sm:$0xff]   ;;  %v854_v12 = vld [vmem:[#allocation5 + $0x40] ss:$8 sps:$4 sm:$0xff]  }
  0x4e   :  { %v864_v10 = vld [vmem:[#allocation7 + $0x40] sm:$0xff]   ;;  %v866_v13 = vld [vmem:[#allocation7 + $0x48] sm:$0xff]   ;;  %v855_v16 = vld [vmem:[#allocation5 + $0x54] ss:$8 sps:$4 sm:$0xff]   ;;  %v1011_v38 = vmov 0.0|0.0   ;;  %v105_v55 = vshrl.u32 %v104_v54, 7 }
  0x4f   :  { %v865_v11 = vld [vmem:[#allocation7] sm:$0xff]   ;;  %653 = vmatprep.subr.bf16.mxu1 %v864_v10  ;;  %v867_v14 = vld [vmem:[#allocation7 + $0x8] sm:$0xff]   ;;  %v857_v17 = vld [vmem:[#allocation5 + $0x50] ss:$8 sps:$4 sm:$0xff]   ;;  %vm1012_vm0 = vmmov 0   ;;  %s1014_s14 = smov [#allocation10]  }
  0x50   :  { %197 = vmatpush1.bf16.msra.mxu0 %v845_v4  ;;  %654 = vmatpush3.bf16.msra.mxu1 %v865_v11  ;;  %v869_v18 = vld [vmem:[#allocation7 + $0x10] sm:$0xff]   ;;  %v870_v19 = vld [vmem:[#allocation7 + $0x58] sm:$0xff]   ;;  %v858_v20 = vld [vmem:[#allocation5 + $0x64] ss:$8 sps:$4 sm:$0xff]   ;;  %v106_v56 = vsub.s32 0, %v105_v55  ;;  %v110_v58 = vsub.s32 1, %v105_v55 }
  0x51   :  { %198 = vmatprep.subr.bf16.mxu0 %v846_v5  ;;  %655 = vmatprep.subr.bf16.mxu1 %v866_v13  ;;  %v860_v21 = vld [vmem:[#allocation5 + $0x60] ss:$8 sps:$4 sm:$0xff]   ;;  %v861_v22 = vld [vmem:[#allocation5 + $0x74] ss:$8 sps:$4 sm:$0xff]   ;;  %v863_v26 = vld [vmem:[#allocation5 + $0x70] ss:$8 sps:$4 sm:$0xff]  }
  0x52   :  { %v871_v23 = vld [vmem:[#allocation7 + $0x18] sm:$0xff]   ;;  %v872_v24 = vld [vmem:[#allocation7 + $0x60] sm:$0xff]   ;;  %v874_v28 = vld [vmem:[#allocation7 + $0x68] sm:$0xff]   ;;  %v1013_v13 = vmov 0.0   ;;  %s607_s17 = sshll.u32 %s1014_s14, 4  ;;  %s608_s17 = int_to_ptr.vmem [resolvable:$true] %s607_s17 }
  0x53   :  { %v873_v25 = vld [vmem:[#allocation7 + $0x20] sm:$0xff]   ;;  %v1114_v27 = vld [vmem:[#allocation2] sm:$0xf]  ;;  %v875_v30 = vld [vmem:[#allocation7 + $0x28] sm:$0xff]   ;;  %s972_s18 = scalar_lea.vmem %s608_s17, 64  ;;  %p977_p5 = scmp.lt.s32.totalorder %s608_s17, %s608_s17 }
  0x54   :  { %199 = vmatpush1.bf16.msra.mxu0 %v848_v6  ;;  %656 = vmatpush3.bf16.msra.mxu1 %v867_v14  ;;  %v85_v29 = vpack.c.bf16 %v1114_v27, %v1114_v27  ;;  %v876_v31 = vld [vmem:[#allocation7 + $0x70] sm:$0xff]   ;;  %v878_v33 = vld [vmem:[#allocation7 + $0x78] sm:$0xff]   ;;  %v415_v35 = vld [vmem:[#allocation8] sm:$0xff]  ;;  %p973_p4 = scmp.ne.s32.totalorder %s608_s17, %s972_s18  ;;  %p978_p6 = scmp.lt.s32.totalorder %s972_s18, %s972_s18 }
  0x55   :  { %200 = vmatprep.subr.bf16.mxu0 %v849_v7  ;;  %657 = vmatprep.subr.bf16.mxu1 %v868_v15  ;;  %v877_v32 = vld [vmem:[#allocation7 + $0x30] sm:$0xff]   ;;  %v879_v34 = vld [vmem:[#allocation7 + $0x38] sm:$0xff]   ;;  %v416_v36 = vld [vmem:[#allocation8 + $0x8] sm:$0xff] }
  0x56   :  { %v417_v37 = vld [vmem:[#allocation8 + $0x10] sm:$0xff]  ;;  %v780_v39 = vpack.c.bf16 %v416_v36, %v415_v35  ;;  %v418_v40 = vld [vmem:[#allocation8 + $0x18] sm:$0xff]  ;;  %v419_v42 = vld [vmem:[#allocation8 + $0x20] sm:$0xff]  ;;  %p979_p7 = por %p978_p6, %p977_p5 }
  0x57   :  { %v783_v41 = vpack.c.bf16 %v418_v40, %v417_v37  ;;  %v420_v43 = vld [vmem:[#allocation8 + $0x28] sm:$0xff]  ;;  %v421_v45 = vld [vmem:[#allocation8 + $0x30] sm:$0xff]  ;;  %v422_v46 = vld [vmem:[#allocation8 + $0x38] sm:$0xff] }
  0x58   :  { %201 = vmatpush1.bf16.msra.mxu0 %v851_v8  ;;  %658 = vmatpush3.bf16.msra.mxu1 %v869_v18  ;;  %v786_v44 = vpack.c.bf16 %v420_v43, %v419_v42  ;;  %v789_v47 = vpack.c.bf16 %v422_v46, %v421_v45  ;;  %v423_v48 = vld [vmem:[#allocation8 + $0x40] sm:$0xff]  ;;  %v424_v49 = vld [vmem:[#allocation8 + $0x48] sm:$0xff]  ;;  %v425_v51 = vld [vmem:[#allocation8 + $0x50] sm:$0xff]  ;;  %p980_p8 = pnand %p979_p7, %p973_p4 }
  0x59   :  { %202 = vmatprep.subr.bf16.mxu0 %v852_v9  ;;  %659 = vmatprep.subr.bf16.mxu1 %v870_v19  ;;  %v792_v50 = vpack.c.bf16 %v424_v49, %v423_v48  ;;  %v426_v52 = vld [vmem:[#allocation8 + $0x58] sm:$0xff]  ;;  %v427_v7 = vld [vmem:[#allocation8 + $0x60] sm:$0xff]  ;;  %v428_v8 = vld [vmem:[#allocation8 + $0x68] sm:$0xff] }
  0x5a   :  { %v795_v53 = vpack.c.bf16 %v426_v52, %v425_v51  ;;  %v102_v57 = vld [vmem:[%s1161_s2] sm:$0x3]  ;;  %v798_v9 = vpack.c.bf16 %v428_v8, %v427_v7  ;;  %v429_v10 = vld [vmem:[#allocation8 + $0x70] sm:$0xff] }
  0x5b   :  { %v107_v59 = vrot.slane %v102_v57, %v106_v56  ;;  %v111_v60 = vrot.slane %v102_v57, %v110_v58  ;;  %v430_v11 = vld [vmem:[#allocation8 + $0x78] sm:$0xff] }
  0x5c   :  { %203 = vmatpush1.bf16.msra.mxu0 %v854_v12  ;;  %660 = vmatpush3.bf16.msra.mxu1 %v871_v23  ;;  %v801_v12 = vpack.c.bf16 %v430_v11, %v429_v10  ;;  %v634_v15 = vld [vmem:[%s1163_s4] ss:$0 sm:$0xff] }
  0x5d   :  { %204 = vmatprep.subr.bf16.mxu0 %v855_v16  ;;  %661 = vmatprep.subr.bf16.mxu1 %v872_v24  ;;  %v651_v36 = vld [vmem:[%s1164_s5] ss:$0 sm:$0xff] }
  0x60   :  { %205 = vmatpush1.bf16.msra.mxu0 %v857_v17  ;;  %662 = vmatpush3.bf16.msra.mxu1 %v873_v25 }
  0x61   :  { %206 = vmatprep.subr.bf16.mxu0 %v858_v20  ;;  %663 = vmatprep.subr.bf16.mxu1 %v874_v28 }
  0x64   :  { %207 = vmatpush1.bf16.msra.mxu0 %v860_v21  ;;  %664 = vmatpush3.bf16.msra.mxu1 %v875_v30 }
  0x65   :  { %208 = vmatprep.subr.bf16.mxu0 %v861_v22  ;;  %665 = vmatprep.subr.bf16.mxu1 %v876_v31 }
  0x68   :  { %209 = vmatpush1.bf16.msra.mxu0 %v863_v26  ;;  %666 = vmatpush3.bf16.msra.mxu1 %v877_v32 }
  0x69   :  { %667 = vmatprep.subr.bf16.mxu1 %v878_v33  ;;  %779 = vmatprep.subr.bf16.mxu0 %v1011_v38 }
  0x6b   :  { %227 = vmatmul.mubr.bf16.vlgmr.msra.gmra.mrb[0].mxu0 %v85_v29 }
  0x6c   :  { %668 = vmatpush3.bf16.msra.mxu1 %v879_v34  ;;  %781 = vmatpush3.bf16.msra.mxu0 %v780_v39 }
  0x6d   :  { %803 = vmatprep.subr.bf16.mxu1 %v1011_v38  ;;  %782 = vmatprep.subr.bf16.mxu0 %v1011_v38 }
  0x6e   :  { %741 = vmatprep.mubr.msk.f32.mxu0 %vm1012_vm0, %v1013_v13 }
  0x70   :  { %784 = vmatpush3.bf16.msra.mxu0 %v783_v41 }
  0x71   :  { %785 = vmatprep.subr.bf16.mxu0 %v1011_v38 }
  0x74   :  { %787 = vmatpush3.bf16.msra.mxu0 %v786_v44 }
  0x75   :  { %788 = vmatprep.subr.bf16.mxu0 %v1011_v38 }
  0x78   :  { %790 = vmatpush3.bf16.msra.mxu0 %v789_v47 }
  0x79   :  { %791 = vmatprep.subr.bf16.mxu0 %v1011_v38 }
  0x7c   :  { %793 = vmatpush3.bf16.msra.mxu0 %v792_v50 }
  0x7d   :  { %794 = vmatprep.subr.bf16.mxu0 %v1011_v38 }
  0x80   :  { %796 = vmatpush3.bf16.msra.mxu0 %v795_v53 }
  0x81   :  { %797 = vmatprep.subr.bf16.mxu0 %v1011_v38 }
  0x84   :  { %799 = vmatpush3.bf16.msra.mxu0 %v798_v9 }
  0x85   :  { %800 = vmatprep.subr.bf16.mxu0 %v1011_v38 }
  0x88   :  { %802 = vmatpush3.bf16.msra.mxu0 %v801_v12 }
 0x13e   :  { %v228_v61 = vpop.f32.mrb[0].mxu0 }
 0x13f   :  { %v229_v62 = vadd.f32 %v228_v61, %v107_v59  ;;  %v230_v63 = vpop.f32.mrb[1].mxu0 }
 0x140   :  { %v231_v0 = vadd.f32 %v230_v63, %v111_v60  ;;  %v232_v1 = vpop.f32.mrb[2].mxu0 }
 0x141   :  { %v235_v2 = vmax.f32 %v229_v62, 0.0  ;;  %v233_v3 = vpop.f32.mrb[3].mxu0 }
 0x142   :  { %v236_v4 = vmax.f32 %v231_v0, 0.0 }
 0x143   :  { %v237_v6 = vpack.c.bf16 %v235_v2, %v235_v2 }
 0x144   :  { %v238_v5 = vpack.c.bf16 %v236_v4, %v236_v4 }
 0x146   :  { %406 = vmatprep.mubr.bf16.mxu1 %v238_v5 }
 0x147   :  { %407 = vmatmul.mubr.bf16.vlgmr.msra.gmra.mrb[0].mxu1 %v237_v6 }
 0x148   :  { %805 = vmatpush3.bf16.msra.mxu1 %v780_v39  ;;  %776 = vmatprep.mubr.msk.f32.mxu1 %vm1012_vm0, %v1013_v13 }
 0x149   :  { %806 = vmatprep.subr.bf16.mxu1 %v1011_v38 }
 0x14c   :  { %808 = vmatpush3.bf16.msra.mxu1 %v783_v41 }
 0x14d   :  { %809 = vmatprep.subr.bf16.mxu1 %v1011_v38 }
 0x150   :  { %811 = vmatpush3.bf16.msra.mxu1 %v786_v44 }
 0x151   :  { %812 = vmatprep.subr.bf16.mxu1 %v1011_v38 }
 0x154   :  { %814 = vmatpush3.bf16.msra.mxu1 %v789_v47 }
 0x155   :  { %815 = vmatprep.subr.bf16.mxu1 %v1011_v38 }
 0x158   :  { %817 = vmatpush3.bf16.msra.mxu1 %v792_v50 }
 0x159   :  { %818 = vmatprep.subr.bf16.mxu1 %v1011_v38 }
 0x15c   :  { %820 = vmatpush3.bf16.msra.mxu1 %v795_v53 }
 0x15d   :  { %821 = vmatprep.subr.bf16.mxu1 %v1011_v38 }
 0x160   :  { %823 = vmatpush3.bf16.msra.mxu1 %v798_v9 }
 0x161   :  { %824 = vmatprep.subr.bf16.mxu1 %v1011_v38  ;;  %v652_v38 = vld [vmem:[%s1165_s6] ss:$0 sm:$0xff] }
 0x164   :  { %826 = vmatpush3.bf16.msra.mxu1 %v801_v12 }
 0x21a   :  { %v669_v14 = vpop.f32.mrb[0].mxu1 }
 0x21b   :  { %v670_v16 = vpop.f32.mrb[1].mxu1 }
 0x21c   :  { %v671_v17 = vadd.f32 %v670_v16, %v669_v14  ;;  %v672_v18 = vpop.f32.mrb[2].mxu1 }
 0x21d   :  { %v673_v19 = vpop.f32.mrb[3].mxu1 }
 0x21e   :  { %v409_v20 = vadd.f32 %v671_v17, %v634_v15 }
 0x220   :  { %v414_v21 = vadd.f32 %v409_v20, %v1114_v27 }
 0x222   :  { %742 = vmatmul.mubr.f32.vlgmr.msra.gmra.mrb[4].mxu0 %v414_v21 }
 0x2f5   :  { %v497_v22 = vpop.f32.mrb[4].mxu0 }
 0x2f6   :  { %v501_v23 = vsub.f32 %v414_v21, %v497_v22  ;;  %v743_v24 = vpop.f32.mrb[5].mxu0 }
 0x2f8   :  { %v502_v25 = vmul.f32 %v501_v23, %v501_v23 }
 0x2fa   :  { %777 = vmatmul.mubr.f32.vlgmr.msra.gmra.mrb[4].mxu1 %v502_v25 }
 0x3cd   :  { %v569_v26 = vpop.f32.mrb[4].mxu1 }
 0x3ce   :  { %v573_v28 = vmul.f32 1.032258, %v569_v26  ;;  %v778_v29 = vpop.f32.mrb[5].mxu1 }
 0x3d0   :  { %880 = vrsqrt.f32 %v573_v28  ;;  %vm576_vm1 = vcmp.eq.f32.partialorder %v573_v28, inf  ;;  %v579_v32 = vand.u32 2147483648, %v573_v28  ;;  %vm578_vm2 = vcmp.eq.f32.partialorder %v573_v28, 0.0 }
 0x3da   :  { %v881_v30 = vpop.eup %880 }
 0x3db   :  { %v575_v31 = vmul.f32 %v881_v30, %v573_v28 }
 0x3dd   :  { %v577_v33 = vsel %vm576_vm1, %v573_v28, %v575_v31 }
 0x3de   :  { %v580_v34 = vsel %vm578_vm2, %v579_v32, %v577_v33 }
 0x3df   :  { %v581_v35 = vadd.f32 1e-06, %v580_v34 }
 0x3e1   :  { %882 = vrcp.f32 %v581_v35 }
 0x3eb   :  { %v883_v27 = vpop.eup %882 }
 0x3ec   :  { %v584_v37 = vmul.f32 %v883_v27, %v501_v23 }
 0x3ee   :  { %v591_v39 = vmul.f32 %v651_v36, %v584_v37 }
 0x3f0   :  { %v599_v40 = vadd.f32 %v652_v38, %v591_v39 }
 0x3f2   :  { %600 = vst [vmem:[#allocation10] sm:$0xf] %v599_v40 }
 0x3f3   :  { %983 = shalt.err (!%p980_p8)
}
 0x3f4   :  { %s984_s0 = scalar_lea.hbm %s1167_s8, 64 }
 0x3f5   :  { %p985_p9 = scmp.ne.s32.totalorder %s1167_s8, %s984_s0  ;;  %p988_p10 = scmp.lt.u32.totalorder %s984_s0, %s1167_s8 }
 0x3f7   :  { %p990_p11 = pnand %p988_p10, %p985_p9 }
 0x3f9   :  { %993 = shalt.err (!%p990_p11)
}
 0x3fa   :  { %610 = dma.vmem_to_hbm [thread:$0]  %s608_s17, 64, %s1167_s8, [#allocation4]  }
 0x3fb   :  { %1000 = dma.done.wait [#allocation4], 64  }
 0x3fc   :  { %1001 = vsyncadd [#allocation4], 4294967232 }
 0x3fd   :  { %614 = vsyncpa [#allocation3], 1 }
 0x3fe   :  { %615 = vsyncpa [#allocation6], 1 }
 0x3ff   :  { %616 = vsyncpa [#allocation9], 1 }
 0x400   :  { %617 = vsyncpa [#allocation4], 1 }

</bundles_post_ra>
